<compile_context>
chip_gen: v7x
topology: tpu7x:2x2x1
jax: 0.10.0
libtpu: 0.0.40
codegen_flags: <defaults>
</compile_context>

<pallas_src>
import functools

import jax
import jax.numpy as jnp
from jax import lax
from jax.experimental import pallas as pl
from jax.experimental.pallas import tpu as pltpu

EPS = 1e-5
LANE = 128


def _vmem_limit_bytes():
    """~3/4 of physical VMEM, capped at 96 MiB; 48 MiB fallback (safe on v7x)."""
    phys = 64 * 1024 * 1024
    try:
        info = pltpu.get_tpu_info()
        phys = int(getattr(info, "vmem_capacity_bytes", phys) or phys)
    except Exception:
        pass
    return int(max(32 * 1024 * 1024, min(phys * 3 // 4, 96 * 1024 * 1024)))


def _largest_divisor_leq(n, cap):
    cap = max(1, min(cap, n))
    for d in range(cap, 0, -1):
        if n % d == 0:
            return d
    return 1


def _conv_stats_kernel(xs_ref, w_ref, b_ref, y_ref, sum_ref, ssq_ref, *,
                       th, wo, nti, ho, mask_rows):
    """Conv(3x3, s=2, reflect pad pre-packed) + bias for one row tile, plus
    per-channel sum / sum-of-squares accumulated across the row tiles.

    xs_ref : (1, th, wo, 16*Cin) bf16  pre-packed taps (contiguous)
    w_ref  : (16*Cin, CT)        bf16
    b_ref  : (1, CT)             f32
    y_ref  : (1, th, wo, CT)     bf16  conv+bias output tile
    sum_ref: (1, 1, 1, CT)       f32   running per-channel sum   (resident over t)
    ssq_ref: (1, 1, 1, CT)       f32   running per-channel sumsq (resident over t)
    """
    t = pl.program_id(3)
    kk = xs_ref.shape[-1]
    ct = y_ref.shape[-1]

    # Single unit-stride MXU matmul per tile (no tap slices, no relayouts).
    lhs = xs_ref[0].reshape(th * wo, kk)
    acc = jnp.dot(lhs, w_ref[...], preferred_element_type=jnp.float32)
    y3 = (acc + b_ref[...]).reshape(th, wo, ct)                   # f32
    y_ref[0] = y3.astype(y_ref.dtype)                             # bf16 store

    @pl.when(t == 0)
    def _():
        sum_ref[...] = jnp.zeros_like(sum_ref)
        ssq_ref[...] = jnp.zeros_like(ssq_ref)

    if mask_rows:   # static: only emitted when Ho was padded to a tile multiple
        row0 = (pl.program_id(1) * nti + t) * th
        rows = lax.broadcasted_iota(jnp.int32, (th, wo, ct), 0) + row0
        ym = jnp.where(rows < ho, y3, 0.0)
    else:
        ym = y3

    # Single-pass stats in f32 (E[x^2]-E[x]^2; fine at InstanceNorm scales).
    sum_ref[...] += jnp.sum(ym, axis=(0, 1), keepdims=True)[None]
    ssq_ref[...] += jnp.sum(ym * ym, axis=(0, 1), keepdims=True)[None]


def _norm_relu_kernel(y_ref, sum_ref, ssq_ref, o_ref, *, inv_p):
    """InstanceNorm (full-extent stats = sum of the per-half partials) + ReLU."""
    s = jnp.sum(sum_ref[0], axis=0)          # (n_s, 1, CT) -> (1, CT)
    ss = jnp.sum(ssq_ref[0], axis=0)
    mean = s * inv_p
    var = jnp.maximum(ss * inv_p - mean * mean, 0.0)   # biased variance (torch)
    inv_std = lax.rsqrt(var + EPS)
    y = y_ref[0].astype(jnp.float32)                   # (th2, wo, CT)
    o_ref[0] = jnp.maximum((y - mean[None]) * inv_std[None], 0.0)


@functools.partial(
    jax.jit,
    static_argnames=("stride", "padding", "max_tile_rows", "cout_tile", "output_layout"),
)
def convolutional_block(x, weight, bias, *, stride=2, padding=1,
                        max_tile_rows=64, cout_tile=None, output_layout="NCHW"):
    """Downsampling ConvolutionalBlock forward.

    x:      (N, C_in, H, W)          float32, NCHW
    weight: (C_out, C_in, 3, 3)      float32  (torch Conv2d layout)
    bias:   (C_out,)                 float32
    returns (N, C_out, H/2, W/2) f32 NCHW, or (N, H/2, W/2, C_out) if
            output_layout == "NHWC" (cheaper when chaining blocks).
    """
    n, c_in, h, w = x.shape
    c_out, c_in_w, k, k2 = weight.shape
    assert k == 3 and k2 == 3 and stride == 2 and padding == 1, \
        "kernel supports k=3, stride=2, padding=1 (CycleGAN downsampling block)"
    assert h % 2 == 0 and w % 2 == 0 and c_in_w == c_in

    ho, wo = h // 2, w // 2
    hs, ws = ho + 1, wo + 1                  # space-to-depth ("superpixel") grid
    ck = 4 * c_in                            # phase channels per tap
    kk = 4 * ck                              # taps folded into channels

    # C_out tiling: 256-wide when it divides evenly (fills v6e/v7x MXU),
    # else 128.  Pass cout_tile=128 on v5e (4x128x128 MXUs).
    c128 = ((c_out + LANE - 1) // LANE) * LANE
    ct = cout_tile if cout_tile is not None else (256 if c128 % 256 == 0 else LANE)
    assert ct % LANE == 0
    c_pad = ((c_out + ct - 1) // ct) * ct
    n_c = c_pad // ct
    p = ho * wo

    vmem_limit = _vmem_limit_bytes()
    tile_budget = vmem_limit // 2            # headroom for weights/stats/scratch

    # ---- pass-1 row tile: xs (bf16, dbuf) + y (bf16, dbuf) + f32 acc/temp.
    row_bytes_1 = 2 * wo * kk * 2 + 2 * wo * ct * 2 + wo * ct * 8
    th = max(1, min(max_tile_rows, ho, tile_budget // max(1, row_bytes_1)))
    n_s = 2 if ho > th else 1                # split spatial axis across cores (v7x)
    nti = -(-ho // (th * n_s))
    ho_pad = n_s * nti * th
    mask_rows = ho_pad != ho

    # ---- pass-2 row tile (decoupled; HBM-bound epilogue -> as big as fits).
    row_bytes_2 = 2 * wo * ct * (2 + 4)
    th2 = _largest_divisor_leq(ho_pad, max(1, tile_budget // max(1, row_bytes_2)))
    n_t2 = ho_pad // th2

    # ---- boundary layout work (plain XLA): NCHW -> NHWC bf16, reflect pad,
    # 2x2 space-to-depth, then fold the 4 conv taps into the channel axis so
    # the kernel does a single contiguous matmul per tile.
    x_nhwc = jnp.transpose(x, (0, 2, 3, 1)).astype(jnp.bfloat16)      # (N,H,W,C)
    xp = jnp.pad(x_nhwc, ((0, 0), (padding, padding), (padding, padding), (0, 0)),
                 mode="reflect")                                      # (N,H+2,W+2,C)
    xs = xp.reshape(n, hs, 2, ws, 2, c_in)
    xs = jnp.transpose(xs, (0, 1, 3, 2, 4, 5)).reshape(n, hs, ws, ck)  # (N,Hs,Ws,4C)
    xs_cat = jnp.concatenate(
        [xs[:, dh:dh + ho, dw:dw + wo, :] for dh in (0, 1) for dw in (0, 1)],
        axis=-1)                                                      # (N,Ho,Wo,16C)
    if mask_rows:
        xs_cat = jnp.pad(xs_cat, ((0, 0), (0, ho_pad - ho), (0, 0), (0, 0)))

    # Weight re-map:  w_cat[(2*dh+dw)*4C + pr*2C + pc*C + ci, co]
    #               = weight[co, ci, 2*dh+pr, 2*dw+pc]   (0 where kh/kw > 2)
    w6 = jnp.zeros((2, 2, 2, 2, c_in, c_pad), jnp.float32)
    for kh in range(3):
        for kw in range(3):
            w_tap = jnp.pad(weight[:, :, kh, kw].T, ((0, 0), (0, c_pad - c_out)))
            w6 = w6.at[kh // 2, kw // 2, kh % 2, kw % 2].set(w_tap)
    w_cat = w6.reshape(kk, c_pad).astype(jnp.bfloat16)
    b_pad = jnp.pad(bias, (0, c_pad - c_out)).reshape(1, c_pad).astype(jnp.float32)

    # ---- pass 1: conv + bias (bf16 y), per-channel sum / sumsq per spatial half.
    conv_kernel = functools.partial(
        _conv_stats_kernel, th=th, wo=wo, nti=nti, ho=ho, mask_rows=mask_rows)
    y, s_sum, s_sq = pl.pallas_call(
        conv_kernel,
        out_shape=(
            jax.ShapeDtypeStruct((n, ho_pad, wo, c_pad), jnp.bfloat16),
            jax.ShapeDtypeStruct((n, n_s, 1, c_pad), jnp.float32),
            jax.ShapeDtypeStruct((n, n_s, 1, c_pad), jnp.float32),
        ),
        grid_spec=pltpu.PrefetchScalarGridSpec(
            num_scalar_prefetch=0,
            grid=(n, n_s, n_c, nti),
            in_specs=[
                pl.BlockSpec((1, th, wo, kk), lambda b, s, c, t: (b, s * nti + t, 0, 0)),
                pl.BlockSpec((kk, ct), lambda b, s, c, t: (0, c)),
                pl.BlockSpec((1, ct), lambda b, s, c, t: (0, c)),
            ],
            out_specs=[
                pl.BlockSpec((1, th, wo, ct), lambda b, s, c, t: (b, s * nti + t, 0, c)),
                pl.BlockSpec((1, 1, 1, ct), lambda b, s, c, t: (b, s, 0, c)),
                pl.BlockSpec((1, 1, 1, ct), lambda b, s, c, t: (b, s, 0, c)),
            ],
        ),
        compiler_params=pltpu.CompilerParams(
            dimension_semantics=("parallel", "parallel", "parallel", "arbitrary"),
            vmem_limit_bytes=vmem_limit,
        ),
        cost_estimate=pl.CostEstimate(
            flops=2 * n * ho_pad * wo * kk * c_pad,
            transcendentals=0,
            bytes_accessed=(n * ho_pad * wo * kk * 2 * n_c + kk * c_pad * 2
                            + n * ho_pad * wo * c_pad * 2 + 2 * n * n_s * c_pad * 4),
        ),
    )(xs_cat, w_cat, b_pad)

    # ---- pass 2: normalize with full-extent stats (sum of halves) + ReLU.
    norm_kernel = functools.partial(_norm_relu_kernel, inv_p=1.0 / p)
    out_pad = pl.pallas_call(
        norm_kernel,
        out_shape=jax.ShapeDtypeStruct((n, ho_pad, wo, c_pad), jnp.float32),
        grid_spec=pltpu.PrefetchScalarGridSpec(
            num_scalar_prefetch=0,
            grid=(n, n_c, n_t2),
            in_specs=[
                pl.BlockSpec((1, th2, wo, ct), lambda b, c, t: (b, t, 0, c)),
                pl.BlockSpec((1, n_s, 1, ct), lambda b, c, t: (b, 0, 0, c)),
                pl.BlockSpec((1, n_s, 1, ct), lambda b, c, t: (b, 0, 0, c)),
            ],
            out_specs=pl.BlockSpec((1, th2, wo, ct), lambda b, c, t: (b, t, 0, c)),
        ),
        compiler_params=pltpu.CompilerParams(
            dimension_semantics=("parallel", "parallel", "parallel"),
            vmem_limit_bytes=vmem_limit,
        ),
        cost_estimate=pl.CostEstimate(
            flops=6 * n * ho_pad * wo * c_pad,
            transcendentals=n * n_t2 * c_pad,
            bytes_accessed=n * ho_pad * wo * c_pad * (2 + 4) + 2 * n * n_s * c_pad * 4,
        ),
    )(y, s_sum, s_sq)

    out = out_pad[:, :ho, :, :c_out]
    if output_layout == "NHWC":
        return out                               # cheaper when chaining blocks
    return jnp.transpose(out, (0, 3, 1, 2))      # PyTorch-facing NCHW


def _reference(x, weight, bias, *, stride=2, padding=1):
    """Pure-JAX (f32) reference matching the PyTorch module."""
    xp = jnp.pad(
        x, ((0, 0), (0, 0), (padding, padding), (padding, padding)), mode="reflect"
    )
    y = lax.conv_general_dilated(
        xp, weight, window_strides=(stride, stride), padding="VALID",
        dimension_numbers=("NCHW", "OIHW", "NCHW"),
    ) + bias.reshape(1, -1, 1, 1)
    mean = jnp.mean(y, axis=(2, 3), keepdims=True)
    var = jnp.mean((y - mean) ** 2, axis=(2, 3), keepdims=True)
    y = (y - mean) * lax.rsqrt(var + EPS)
    return jnp.maximum(y, 0.0)


if __name__ == "__main__":
    key = jax.random.PRNGKey(0)
    kx, kw, kb = jax.random.split(key, 3)

    N, C_IN, C_OUT, H, W, K = 2, 4, 8, 16, 16, 3

    x = jax.random.normal(kx, (N, C_IN, H, W), dtype=jnp.float32)
    weight = jax.random.normal(kw, (C_OUT, C_IN, K, K), dtype=jnp.float32) * 0.1
    bias = jax.random.normal(kb, (C_OUT,), dtype=jnp.float32) * 0.1

    ref = _reference(x, weight, bias, stride=2, padding=1)

    # (a) default tiling: single spatial tile per batch (fast path).
    out_a = jax.block_until_ready(convolutional_block(x, weight, bias))
    # (b) tiny row tile: exercises the two-half partial-stats split, the
    #     cross-tile stats accumulation, and the masked (padded-rows) path.
    out_b = jax.block_until_ready(
        convolutional_block(x, weight, bias, max_tile_rows=3))

    assert out_a.shape == out_b.shape == ref.shape == (N, C_OUT, 8, 8), out_a.shape
    # bf16 MXU operands + bf16 packed input / intermediate y vs the f32
    # reference -> looser tolerance than a pure-f32 pipeline.
    for out in (out_a, out_b):
        err = float(jnp.max(jnp.abs(out - ref)))
        assert jnp.allclose(out, ref, atol=5e-2, rtol=5e-2), f"mismatch vs reference: {err}"

    print("KERNEL_OK")
</pallas_src>

<mosaic_0001>
module attributes {stable_mosaic.version = 11 : i64} {
  func.func @_conv_stats_kernel(%arg0: i32, %arg1: i32, %arg2: i32, %arg3: i32, %arg4: memref<1x8x8x64xbf16, #tpu.memory_space<vmem>>, %arg5: memref<64x128xbf16, #tpu.memory_space<vmem>>, %arg6: memref<1x128xf32, #tpu.memory_space<vmem>>, %arg7: memref<1x8x8x128xbf16, #tpu.memory_space<vmem>>, %arg8: memref<1x1x1x128xf32, #tpu.memory_space<vmem>>, %arg9: memref<1x1x1x128xf32, #tpu.memory_space<vmem>>) attributes {dimension_semantics = [#tpu.dimension_semantics<parallel>, #tpu.dimension_semantics<parallel>, #tpu.dimension_semantics<parallel>, #tpu.dimension_semantics<arbitrary>], iteration_bounds = array<i64: 2, 1, 1, 1>, scalar_prefetch = 0 : i64, scratch_operands = 0 : i64, tpu.core_type = #tpu.core_type<tc>, window_params = [{transform_indices = @transform_0, window_bounds = array<i64: 1, 8, 8, 64>}, {transform_indices = @transform_1, window_bounds = array<i64: 64, 128>}, {transform_indices = @transform_2, window_bounds = array<i64: 1, 128>}, {transform_indices = @transform_3, window_bounds = array<i64: 1, 8, 8, 128>}, {transform_indices = @transform_4, window_bounds = array<i64: 1, 1, 1, 128>}, {transform_indices = @transform_5, window_bounds = array<i64: 1, 1, 1, 128>}]} {
    %c0 = arith.constant 0 : index
    %c0_0 = arith.constant 0 : index
    %c0_1 = arith.constant 0 : index
    %c0_2 = arith.constant 0 : index
    %0 = vector.load %arg4[%c0, %c0_0, %c0_1, %c0_2] : memref<1x8x8x64xbf16, #tpu.memory_space<vmem>>, vector<1x8x8x64xbf16>
    %1 = vector.shape_cast %0 : vector<1x8x8x64xbf16> to vector<8x8x64xbf16>
    %2 = vector.shape_cast %1 : vector<8x8x64xbf16> to vector<64x64xbf16>
    %c0_3 = arith.constant 0 : index
    %c0_4 = arith.constant 0 : index
    %3 = vector.load %arg5[%c0_3, %c0_4] : memref<64x128xbf16, #tpu.memory_space<vmem>>, vector<64x128xbf16>
    %cst = arith.constant dense<0.000000e+00> : vector<64x128xf32>
    %4 = tpu.matmul %2, %3, %cst {dimension_numbers = #tpu.dot_dimension_numbers<[1], [0], [0], [1], [0, 0, 1, 1], [], []>} : vector<64x64xbf16>, vector<64x128xbf16>, vector<64x128xf32> -> vector<64x128xf32>
    %c0_5 = arith.constant 0 : index
    %c0_6 = arith.constant 0 : index
    %5 = vector.load %arg6[%c0_5, %c0_6] : memref<1x128xf32, #tpu.memory_space<vmem>>, vector<1x128xf32>
    %6 = vector.broadcast %5 : vector<1x128xf32> to vector<64x128xf32>
    %7 = arith.addf %4, %6 : vector<64x128xf32>
    %8 = vector.shape_cast %7 : vector<64x128xf32> to vector<8x8x128xf32>
    %9 = arith.truncf %8 : vector<8x8x128xf32> to vector<8x8x128xbf16>
    %c0_7 = arith.constant 0 : index
    %c0_8 = arith.constant 0 : index
    %c0_9 = arith.constant 0 : index
    %c0_10 = arith.constant 0 : index
    %10 = vector.load %arg7[%c0_7, %c0_8, %c0_9, %c0_10] : memref<1x8x8x128xbf16, #tpu.memory_space<vmem>>, vector<1x8x8x128xbf16>
    %11 = vector.shape_cast %10 : vector<1x8x8x128xbf16> to vector<8x8x128xbf16>
    %12 = vector.shape_cast %9 : vector<8x8x128xbf16> to vector<1x8x8x128xbf16>
    tpu.vector_store %arg7[%c0_7, %c0_8, %c0_9, %c0_10], %12 {strides = array<i32>} : memref<1x8x8x128xbf16, #tpu.memory_space<vmem>>, vector<1x8x8x128xbf16>,
    %c0_i32 = arith.constant 0 : i32
    %13 = arith.cmpi eq, %arg3, %c0_i32 : i32
    %14 = arith.extui %13 : i1 to i32
    %c0_i32_11 = arith.constant 0 : i32
    %15 = arith.cmpi ne, %14, %c0_i32_11 : i32
    scf.if %15 {
      %cst_30 = arith.constant 0.000000e+00 : f32
      %29 = vector.broadcast %cst_30 : f32 to vector<1x1x1x128xf32>
      %c0_31 = arith.constant 0 : index
      %c0_32 = arith.constant 0 : index
      %c0_33 = arith.constant 0 : index
      %c0_34 = arith.constant 0 : index
      %30 = vector.load %arg8[%c0_31, %c0_32, %c0_33, %c0_34] : memref<1x1x1x128xf32, #tpu.memory_space<vmem>>, vector<1x1x1x128xf32>
      tpu.vector_store %arg8[%c0_31, %c0_32, %c0_33, %c0_34], %29 {strides = array<i32>} : memref<1x1x1x128xf32, #tpu.memory_space<vmem>>, vector<1x1x1x128xf32>,
      %cst_35 = arith.constant 0.000000e+00 : f32
      %31 = vector.broadcast %cst_35 : f32 to vector<1x1x1x128xf32>
      %c0_36 = arith.constant 0 : index
      %c0_37 = arith.constant 0 : index
      %c0_38 = arith.constant 0 : index
      %c0_39 = arith.constant 0 : index
      %32 = vector.load %arg9[%c0_36, %c0_37, %c0_38, %c0_39] : memref<1x1x1x128xf32, #tpu.memory_space<vmem>>, vector<1x1x1x128xf32>
      tpu.vector_store %arg9[%c0_36, %c0_37, %c0_38, %c0_39], %31 {strides = array<i32>} : memref<1x1x1x128xf32, #tpu.memory_space<vmem>>, vector<1x1x1x128xf32>,
    } else {
    }
    %c0_12 = arith.constant 0 : index
    %c0_13 = arith.constant 0 : index
    %c0_14 = arith.constant 0 : index
    %c0_15 = arith.constant 0 : index
    %16 = vector.load %arg8[%c0_12, %c0_13, %c0_14, %c0_15] : memref<1x1x1x128xf32, #tpu.memory_space<vmem>>, vector<1x1x1x128xf32>
    %cst_16 = arith.constant dense<0.000000e+00> : vector<128xf32>
    %17 = vector.multi_reduction <add>, %8, %cst_16 [0, 1] : vector<8x8x128xf32> to vector<128xf32>
    %18 = vector.shape_cast %17 : vector<128xf32> to vector<1x1x128xf32>
    %19 = vector.shape_cast %18 : vector<1x1x128xf32> to vector<1x1x1x128xf32>
    %20 = arith.addf %16, %19 : vector<1x1x1x128xf32>
    %c0_17 = arith.constant 0 : index
    %c0_18 = arith.constant 0 : index
    %c0_19 = arith.constant 0 : index
    %c0_20 = arith.constant 0 : index
    %21 = vector.load %arg8[%c0_17, %c0_18, %c0_19, %c0_20] : memref<1x1x1x128xf32, #tpu.memory_space<vmem>>, vector<1x1x1x128xf32>
    tpu.vector_store %arg8[%c0_17, %c0_18, %c0_19, %c0_20], %20 {strides = array<i32>} : memref<1x1x1x128xf32, #tpu.memory_space<vmem>>, vector<1x1x1x128xf32>,
    %c0_21 = arith.constant 0 : index
    %c0_22 = arith.constant 0 : index
    %c0_23 = arith.constant 0 : index
    %c0_24 = arith.constant 0 : index
    %22 = vector.load %arg9[%c0_21, %c0_22, %c0_23, %c0_24] : memref<1x1x1x128xf32, #tpu.memory_space<vmem>>, vector<1x1x1x128xf32>
    %23 = arith.mulf %8, %8 : vector<8x8x128xf32>
    %cst_25 = arith.constant dense<0.000000e+00> : vector<128xf32>
    %24 = vector.multi_reduction <add>, %23, %cst_25 [0, 1] : vector<8x8x128xf32> to vector<128xf32>
    %25 = vector.shape_cast %24 : vector<128xf32> to vector<1x1x128xf32>
    %26 = vector.shape_cast %25 : vector<1x1x128xf32> to vector<1x1x1x128xf32>
    %27 = arith.addf %22, %26 : vector<1x1x1x128xf32>
    %c0_26 = arith.constant 0 : index
    %c0_27 = arith.constant 0 : index
    %c0_28 = arith.constant 0 : index
    %c0_29 = arith.constant 0 : index
    %28 = vector.load %arg9[%c0_26, %c0_27, %c0_28, %c0_29] : memref<1x1x1x128xf32, #tpu.memory_space<vmem>>, vector<1x1x1x128xf32>
    tpu.vector_store %arg9[%c0_26, %c0_27, %c0_28, %c0_29], %27 {strides = array<i32>} : memref<1x1x1x128xf32, #tpu.memory_space<vmem>>, vector<1x1x1x128xf32>,
    return
  }
  func.func @transform_0(%arg0: i32, %arg1: i32, %arg2: i32, %arg3: i32) -> (i32, i32, i32, i32) {
    %c1_i32 = arith.constant 1 : i32
    %0 = arith.muli %arg1, %c1_i32 : i32
    %1 = arith.addi %0, %arg3 : i32
    %c0_i32 = arith.constant 0 : i32
    %c0_i32_0 = arith.constant 0 : i32
    %c0_i32_1 = arith.constant 0 : i32
    return %arg0, %1, %c0_i32, %c0_i32_0 : i32, i32, i32, i32
  }
  func.func @transform_1(%arg0: i32, %arg1: i32, %arg2: i32, %arg3: i32) -> (i32, i32) {
    %c0_i32 = arith.constant 0 : i32
    %c0_i32_0 = arith.constant 0 : i32
    return %c0_i32, %arg2 : i32, i32
  }
  func.func @transform_2(%arg0: i32, %arg1: i32, %arg2: i32, %arg3: i32) -> (i32, i32) {
    %c0_i32 = arith.constant 0 : i32
    %c0_i32_0 = arith.constant 0 : i32
    return %c0_i32, %arg2 : i32, i32
  }
  func.func @transform_3(%arg0: i32, %arg1: i32, %arg2: i32, %arg3: i32) -> (i32, i32, i32, i32) {
    %c1_i32 = arith.constant 1 : i32
    %0 = arith.muli %arg1, %c1_i32 : i32
    %1 = arith.addi %0, %arg3 : i32
    %c0_i32 = arith.constant 0 : i32
    %c0_i32_0 = arith.constant 0 : i32
    return %arg0, %1, %c0_i32, %arg2 : i32, i32, i32, i32
  }
  func.func @transform_4(%arg0: i32, %arg1: i32, %arg2: i32, %arg3: i32) -> (i32, i32, i32, i32) {
    %c0_i32 = arith.constant 0 : i32
    %c0_i32_0 = arith.constant 0 : i32
    return %arg0, %arg1, %c0_i32, %arg2 : i32, i32, i32, i32
  }
  func.func @transform_5(%arg0: i32, %arg1: i32, %arg2: i32, %arg3: i32) -> (i32, i32, i32, i32) {
    %c0_i32 = arith.constant 0 : i32
    %c0_i32_0 = arith.constant 0 : i32
    return %arg0, %arg1, %c0_i32, %arg2 : i32, i32, i32, i32
  }
}

module attributes {stable_mosaic.version = 11 : i64} {
  func.func @_norm_relu_kernel(%arg0: i32, %arg1: i32, %arg2: i32, %arg3: memref<1x8x8x128xbf16, #tpu.memory_space<vmem>>, %arg4: memref<1x1x1x128xf32, #tpu.memory_space<vmem>>, %arg5: memref<1x1x1x128xf32, #tpu.memory_space<vmem>>, %arg6: memref<1x8x8x128xf32, #tpu.memory_space<vmem>>) attributes {dimension_semantics = [#tpu.dimension_semantics<parallel>, #tpu.dimension_semantics<parallel>, #tpu.dimension_semantics<parallel>], iteration_bounds = array<i64: 2, 1, 1>, scalar_prefetch = 0 : i64, scratch_operands = 0 : i64, tpu.core_type = #tpu.core_type<tc>, window_params = [{transform_indices = @transform_0, window_bounds = array<i64: 1, 8, 8, 128>}, {transform_indices = @transform_1, window_bounds = array<i64: 1, 1, 1, 128>}, {transform_indices = @transform_2, window_bounds = array<i64: 1, 1, 1, 128>}, {transform_indices = @transform_3, window_bounds = array<i64: 1, 8, 8, 128>}]} {
    %c0 = arith.constant 0 : index
    %c0_0 = arith.constant 0 : index
    %c0_1 = arith.constant 0 : index
    %c0_2 = arith.constant 0 : index
    %0 = vector.load %arg4[%c0, %c0_0, %c0_1, %c0_2] : memref<1x1x1x128xf32, #tpu.memory_space<vmem>>, vector<1x1x1x128xf32>
    %1 = vector.shape_cast %0 : vector<1x1x1x128xf32> to vector<1x1x128xf32>
    %cst = arith.constant dense<0.000000e+00> : vector<1x128xf32>
    %2 = vector.multi_reduction <add>, %1, %cst [0] : vector<1x1x128xf32> to vector<1x128xf32>
    %c0_3 = arith.constant 0 : index
    %c0_4 = arith.constant 0 : index
    %c0_5 = arith.constant 0 : index
    %c0_6 = arith.constant 0 : index
    %3 = vector.load %arg5[%c0_3, %c0_4, %c0_5, %c0_6] : memref<1x1x1x128xf32, #tpu.memory_space<vmem>>, vector<1x1x1x128xf32>
    %4 = vector.shape_cast %3 : vector<1x1x1x128xf32> to vector<1x1x128xf32>
    %cst_7 = arith.constant dense<0.000000e+00> : vector<1x128xf32>
    %5 = vector.multi_reduction <add>, %4, %cst_7 [0] : vector<1x1x128xf32> to vector<1x128xf32>
    %cst_8 = arith.constant 1.562500e-02 : f32
    %6 = vector.broadcast %cst_8 : f32 to vector<1x128xf32>
    %7 = arith.mulf %2, %6 : vector<1x128xf32>
    %cst_9 = arith.constant 1.562500e-02 : f32
    %8 = vector.broadcast %cst_9 : f32 to vector<1x128xf32>
    %9 = arith.mulf %5, %8 : vector<1x128xf32>
    %10 = arith.mulf %7, %7 : vector<1x128xf32>
    %11 = arith.subf %9, %10 : vector<1x128xf32>
    %cst_10 = arith.constant 0.000000e+00 : f32
    %12 = vector.broadcast %cst_10 : f32 to vector<1x128xf32>
    %13 = arith.maximumf %11, %12 : vector<1x128xf32>
    %cst_11 = arith.constant 9.99999974E-6 : f32
    %14 = vector.broadcast %cst_11 : f32 to vector<1x128xf32>
    %15 = arith.addf %13, %14 : vector<1x128xf32>
    %16 = math.rsqrt %15 : vector<1x128xf32>
    %c0_12 = arith.constant 0 : index
    %c0_13 = arith.constant 0 : index
    %c0_14 = arith.constant 0 : index
    %c0_15 = arith.constant 0 : index
    %17 = vector.load %arg3[%c0_12, %c0_13, %c0_14, %c0_15] : memref<1x8x8x128xbf16, #tpu.memory_space<vmem>>, vector<1x8x8x128xbf16>
    %18 = vector.shape_cast %17 : vector<1x8x8x128xbf16> to vector<8x8x128xbf16>
    %19 = arith.extf %18 : vector<8x8x128xbf16> to vector<8x8x128xf32>
    %20 = vector.shape_cast %7 : vector<1x128xf32> to vector<1x1x128xf32>
    %21 = vector.broadcast %20 : vector<1x1x128xf32> to vector<8x8x128xf32>
    %22 = arith.subf %19, %21 : vector<8x8x128xf32>
    %23 = vector.shape_cast %16 : vector<1x128xf32> to vector<1x1x128xf32>
    %24 = vector.broadcast %23 : vector<1x1x128xf32> to vector<8x8x128xf32>
    %25 = arith.mulf %22, %24 : vector<8x8x128xf32>
    %cst_16 = arith.constant 0.000000e+00 : f32
    %26 = vector.broadcast %cst_16 : f32 to vector<8x8x128xf32>
    %27 = arith.maximumf %25, %26 : vector<8x8x128xf32>
    %c0_17 = arith.constant 0 : index
    %c0_18 = arith.constant 0 : index
    %c0_19 = arith.constant 0 : index
    %c0_20 = arith.constant 0 : index
    %28 = vector.load %arg6[%c0_17, %c0_18, %c0_19, %c0_20] : memref<1x8x8x128xf32, #tpu.memory_space<vmem>>, vector<1x8x8x128xf32>
    %29 = vector.shape_cast %28 : vector<1x8x8x128xf32> to vector<8x8x128xf32>
    %30 = vector.shape_cast %27 : vector<8x8x128xf32> to vector<1x8x8x128xf32>
    tpu.vector_store %arg6[%c0_17, %c0_18, %c0_19, %c0_20], %30 {strides = array<i32>} : memref<1x8x8x128xf32, #tpu.memory_space<vmem>>, vector<1x8x8x128xf32>,
    return
  }
  func.func @transform_0(%arg0: i32, %arg1: i32, %arg2: i32) -> (i32, i32, i32, i32) {
    %c0_i32 = arith.constant 0 : i32
    %c0_i32_0 = arith.constant 0 : i32
    return %arg0, %arg2, %c0_i32, %arg1 : i32, i32, i32, i32
  }
  func.func @transform_1(%arg0: i32, %arg1: i32, %arg2: i32) -> (i32, i32, i32, i32) {
    %c0_i32 = arith.constant 0 : i32
    %c0_i32_0 = arith.constant 0 : i32
    %c0_i32_1 = arith.constant 0 : i32
    return %arg0, %c0_i32, %c0_i32_0, %arg1 : i32, i32, i32, i32
  }
  func.func @transform_2(%arg0: i32, %arg1: i32, %arg2: i32) -> (i32, i32, i32, i32) {
    %c0_i32 = arith.constant 0 : i32
    %c0_i32_0 = arith.constant 0 : i32
    %c0_i32_1 = arith.constant 0 : i32
    return %arg0, %c0_i32, %c0_i32_0, %arg1 : i32, i32, i32, i32
  }
  func.func @transform_3(%arg0: i32, %arg1: i32, %arg2: i32) -> (i32, i32, i32, i32) {
    %c0_i32 = arith.constant 0 : i32
    %c0_i32_0 = arith.constant 0 : i32
    return %arg0, %arg2, %c0_i32, %arg1 : i32, i32, i32, i32
  }
}

</mosaic_0001>

<bundles_post_ra>
// kernel: convolutional_block.3
= control target key start
LH: loop header
LB: loop body
LE: loop exit
PB: predicated region body
PF: predicated region fallthrough
CT: control target
= control target key end

     0   :  { %s586_s12 = smov 0   ;;  %s588_s13 = smov 0   ;;  %s631_s0 = inlined_call_operand.vmem [shape: bf16[2,8,8,128], index: 0, kind: input, shape index: {}]   ;;  %s632_s1 = inlined_call_operand.vmem [shape: f32[2,1,1,128], index: 1, kind: input, shape index: {}]   ;;  %s633_s2 = inlined_call_operand.vmem [shape: f32[2,1,1,128], index: 2, kind: input, shape index: {}]   ;;  %s634_s3 = inlined_call_operand.vmem [shape: f32[2,8,8,128], index: 3, kind: output, shape index: {}]  }
   0x1   :  { %s590_s14 = smov 0  }
   0x2 LB: > { %s32_s15 = sadd.s32 1, %s560_s13  ;;  %p488_p0 = scmp.ge.s32.totalorder %s564_s14, 1  ;;  %s564_s14 = sphi %s590_s14, %s13_s14   ;;  %s560_s13 = sphi %s588_s13, %s636_s13   ;;  %s556_s12 = sphi %s586_s12, %s635_s12  }
   0x3   : > { %p34_p1 = scmp.ge.s32.totalorder %s32_s15, 2  ;;  %p198_p2 = scmp.lt.s32.totalorder %s564_s14, 3 }
   0x5   : > { %s638_s15 = smov (%p34_p1, %s32_s15), 0  ;;  %p199_p3 = pnand %p488_p0, %p198_p2 }
   0x6   : > { %p249_p4 = scmp.lt.s32.totalorder (!%p199_p3), %s556_s12, 1  ;;  %v314_v5 = vlaneseq (!%p199_p3) }
   0x7   : > { %202 = sbr.rel (%p199_p3) target bundleno = 48 (0x30), region = 32 }
   0x8   : > { %v315_v8 = vshrl.u32 (!%p199_p3), %v314_v5, 7 }
   0xa   : > { %v316_v11 = vsub.s32 (!%p199_p3), 0, %v315_v8 }
   0xe   : > { %s640_s12 = smov (!%p249_p4, %s556_s12), 1 }
   0xf   : > { %s266_s18 = scalar_lea.vmem %s632_s1, %s640_s12  ;;  %s272_s21 = scalar_lea.vmem %s633_s2, %s640_s12 }
  0x10   : > { %v286_v0 = vld [vmem:[%s266_s18] sm:$0x1]  ;;  %s495_s22 = sshll.u32 %s640_s12, 5  ;;  %s496_s26 = sshll.u32 %s640_s12, 6 }
  0x11   : > { %v288_v1 = vld [vmem:[%s272_s21] sm:$0x1]  ;;  %v290_v2 = vmul.f32 0.015625, %v286_v0  ;;  %s259_s25 = scalar_lea.vmem %s631_s0, %s495_s22  ;;  %s284_s29 = scalar_lea.vmem %s634_s3, %s496_s26 }
  0x12   : > { %v291_v3 = vmul.f32 0.015625, %v288_v1  ;;  %v498_v10 = vld [vmem:[%s259_s25] sm:$0xff]   ;;  %v513_v12 = vld [vmem:[%s259_s25 + $0x8] sm:$0xff]   ;;  %v514_v13 = vld [vmem:[%s259_s25 + $0x10] sm:$0xff]  }
  0x13   : > { %v292_v4 = vmul.f32 %v290_v2, %v290_v2  ;;  %v515_v14 = vld [vmem:[%s259_s25 + $0x18] sm:$0xff]   ;;  %v499_v15 = vunpack.c.l.bf16 %v498_v10  ;;  %v317_v16 = vrot.slane %v290_v2, %v316_v11  ;;  %v500_v17 = vunpack.c.h.bf16 %v498_v10 }
  0x14   : > { %v503_v18 = vunpack.c.l.bf16 %v513_v12  ;;  %v504_v19 = vunpack.c.h.bf16 %v513_v12  ;;  %v507_v20 = vunpack.c.l.bf16 %v514_v13  ;;  %v508_v21 = vunpack.c.h.bf16 %v514_v13 }
  0x15   : > { %v293_v6 = vsub.f32 %v291_v3, %v292_v4  ;;  %v511_v22 = vunpack.c.l.bf16 %v515_v14  ;;  %v512_v23 = vunpack.c.h.bf16 %v515_v14  ;;  %v319_v24 = vsub.f32 %v499_v15, %v317_v16 }
  0x16   : > { %v320_v25 = vsub.f32 %v500_v17, %v317_v16  ;;  %v321_v26 = vsub.f32 %v503_v18, %v317_v16  ;;  %v322_v27 = vsub.f32 %v504_v19, %v317_v16  ;;  %v323_v29 = vsub.f32 %v507_v20, %v317_v16 }
  0x17   : > { %v294_v7 = vmax.f32 %v293_v6, 0.0  ;;  %v324_v30 = vsub.f32 %v508_v21, %v317_v16  ;;  %v325_v31 = vsub.f32 %v511_v22, %v317_v16  ;;  %v326_v32 = vsub.f32 %v512_v23, %v317_v16 }
  0x19   : > { %v295_v9 = vadd.f32 1e-05, %v294_v7 }
  0x1b   : > { %540 = vrsqrt.f32 %v295_v9 }
  0x25   : > { %v541_v28 = vpop.eup %540 }
  0x26   : > { %v331_v33 = vrot.slane %v541_v28, %v316_v11 }
  0x28   : > { %v333_v34 = vmul.f32 %v331_v33, %v319_v24  ;;  %v334_v35 = vmul.f32 %v331_v33, %v320_v25  ;;  %v335_v36 = vmul.f32 %v331_v33, %v321_v26  ;;  %v336_v37 = vmul.f32 %v331_v33, %v322_v27 }
  0x29   : > { %v337_v38 = vmul.f32 %v331_v33, %v323_v29  ;;  %v338_v39 = vmul.f32 %v331_v33, %v324_v30  ;;  %v339_v40 = vmul.f32 %v331_v33, %v325_v31  ;;  %v340_v41 = vmul.f32 %v331_v33, %v326_v32 }
  0x2a   : > { %v341_v42 = vmax.f32 %v333_v34, 0.0  ;;  %v342_v43 = vmax.f32 %v334_v35, 0.0  ;;  %v343_v44 = vmax.f32 %v335_v36, 0.0  ;;  %v344_v45 = vmax.f32 %v336_v37, 0.0 }
  0x2b   : > { %v345_v46 = vmax.f32 %v337_v38, 0.0  ;;  %v346_v47 = vmax.f32 %v338_v39, 0.0  ;;  %v347_v48 = vmax.f32 %v339_v40, 0.0  ;;  %v348_v49 = vmax.f32 %v340_v41, 0.0 }
  0x2c   : > { %349 = vst [vmem:[%s284_s29] sm:$0xff] %v341_v42  ;;  %350 = vst [vmem:[%s284_s29 + $0x8] sm:$0xff] %v342_v43 }
  0x2d   : > { %351 = vst [vmem:[%s284_s29 + $0x10] sm:$0xff] %v343_v44  ;;  %352 = vst [vmem:[%s284_s29 + $0x18] sm:$0xff] %v344_v45 }
  0x2e   : > { %353 = vst [vmem:[%s284_s29 + $0x20] sm:$0xff] %v345_v46  ;;  %354 = vst [vmem:[%s284_s29 + $0x28] sm:$0xff] %v346_v47 }
  0x2f   : > { %355 = vst [vmem:[%s284_s29 + $0x30] sm:$0xff] %v347_v48  ;;  %356 = vst [vmem:[%s284_s29 + $0x38] sm:$0xff] %v348_v49 }
  0x30 PF: > { %s13_s14 = sadd.s32 1, %s564_s14   ;;  %s635_s12 = smov %s560_s13 }
  0x31   : > { %p10_p5 = scmp.ge.s32.totalorder %s13_s14, 4   ;;  %s636_s13 = smov %s638_s15 }
  0x33   :  { %12 = sbr.rel (!%p10_p5) target bundleno = 2 (0x2), region = 68 }

// kernel: convolutional_block.2
= control target key start
LH: loop header
LB: loop body
LE: loop exit
PB: predicated region body
PF: predicated region fallthrough
CT: control target
= control target key end

     0   :  { %s980_s18 = smov 0   ;;  %s982_s19 = smov 0   ;;  %s1057_s0 = inlined_call_operand.vmem [shape: bf16[2,8,8,64], index: 0, kind: input, shape index: {}]   ;;  %s1058_s1 = inlined_call_operand.vmem [shape: bf16[64,128], index: 1, kind: input, shape index: {}]   ;;  %s1059_s2 = inlined_call_operand.vmem [shape: f32[1,128], index: 2, kind: input, shape index: {}]   ;;  %s1060_s3 = inlined_call_operand.vmem [shape: bf16[2,8,8,128], index: 3, kind: output, shape index: {0}]   ;;  %s1061_s4 = inlined_call_operand.vmem [shape: f32[2,1,1,128], index: 4, kind: output, shape index: {1}]   ;;  %s1062_s5 = inlined_call_operand.vmem [shape: f32[2,1,1,128], index: 5, kind: output, shape index: {2}]  }
   0x1   :  { %s984_s20 = smov 0  }
   0x2 LB: > { %s42_s21 = sadd.s32 1, %s943_s19  ;;  %p815_p0 = scmp.ge.s32.totalorder %s947_s20, 1  ;;  %s947_s20 = sphi %s984_s20, %s16_s20   ;;  %s943_s19 = sphi %s982_s19, %s1064_s19   ;;  %s939_s18 = sphi %s980_s18, %s1063_s18  }
   0x3   : > { %p44_p1 = scmp.ge.s32.totalorder %s42_s21, 2  ;;  %p260_p2 = scmp.lt.s32.totalorder %s947_s20, 3 }
   0x5   : > { %s1066_s21 = smov (%p44_p1, %s42_s21), 0  ;;  %p261_p3 = pnand %p815_p0, %p260_p2 }
   0x6   : > { %v917_v0 = vld [vmem:[%s1058_s1] sm:$0xff] (!%p261_p3)   ;;  %p328_p4 = scmp.lt.s32.totalorder (!%p261_p3), %s939_s18, 1  ;;  %v918_v1 = vld [vmem:[%s1058_s1 + $0x8] sm:$0xff] (!%p261_p3)   ;;  %v919_v2 = vld [vmem:[%s1058_s1 + $0x10] sm:$0xff] (!%p261_p3)   ;;  %vm446_vm0 = vcmask (!%p261_p3), 523264   ;;  %v949_v8 = vmov (!%p261_p3), 0.0  }
   0x7   : > { %264 = sbr.rel (%p261_p3) target bundleno = 271 (0x10f), region = 32  ;;  %868 = vmatprep.subr.bf16.mxu0 (!%p261_p3), %v917_v0  ;;  %884 = vmatprep.subr.bf16.mxu1 (!%p261_p3), %v917_v0  ;;  %v920_v4 = vld [vmem:[%s1058_s1 + $0x18] sm:$0xff] (!%p261_p3)   ;;  %v820_v9 = vld [vmem:[%s1059_s2] ss:$0 sm:$0xff] (!%p261_p3) }
   0x8   : > { %869 = vmatpush3.bf16.msra.mxu0 (!%p261_p3), %v917_v0  ;;  %888 = vmatpush3.bf16.msra.mxu1 (!%p261_p3), %v917_v0 }
   0x9   : > { %870 = vmatprep.subr.bf16.mxu0 (!%p261_p3), %v918_v1  ;;  %885 = vmatprep.subr.bf16.mxu1 (!%p261_p3), %v918_v1 }
   0xc   : > { %871 = vmatpush3.bf16.msra.mxu0 (!%p261_p3), %v918_v1  ;;  %889 = vmatpush3.bf16.msra.mxu1 (!%p261_p3), %v918_v1 }
   0xd   : > { %872 = vmatprep.subr.bf16.mxu0 (!%p261_p3), %v919_v2  ;;  %886 = vmatprep.subr.bf16.mxu1 (!%p261_p3), %v919_v2 }
   0xe   : > { %s1068_s18 = smov (!%p328_p4, %s939_s18), 1 }
   0xf   : > { %s835_s28 = sshll.u32 %s1068_s18, 5  ;;  %s1026_s11 = scalar_lea.vmem %s1061_s4, %s1068_s18 }
  0x10   : > { %s335_s6 = scalar_lea.vmem %s1057_s0, %s835_s28  ;;  %873 = vmatpush3.bf16.msra.mxu0 %v919_v2  ;;  %890 = vmatpush3.bf16.msra.mxu1 %v919_v2  ;;  %s1032_s14 = scalar_lea.vmem %s1062_s5, %s1068_s18  ;;  %544 = vst [vmem:[%s1026_s11] sm:$0x1] %v949_v8 }
  0x11   : > { %v921_v3 = vld [vmem:[%s335_s6] sm:$0xff]   ;;  %v923_v5 = vld [vmem:[%s335_s6 + $0x10] sm:$0xff]   ;;  %874 = vmatprep.subr.bf16.mxu0 %v920_v4  ;;  %887 = vmatprep.subr.bf16.mxu1 %v920_v4  ;;  %v922_v6 = vld [vmem:[%s335_s6 + $0x8] sm:$0xff]   ;;  %545 = vst [vmem:[%s1032_s14] sm:$0x1] %v949_v8  ;;  %s357_s23 = scalar_lea.vmem %s1060_s3, %s835_s28 }
  0x12   : > { %876 = vmatprep.mubr.msk.bf16.mxu0 %vm446_vm0, %v921_v3  ;;  %880 = vmatprep.mubr.msk.bf16.mxu1 %vm446_vm0, %v923_v5  ;;  %v924_v7 = vld [vmem:[%s335_s6 + $0x18] sm:$0xff]  }
  0x14   : > { %875 = vmatpush3.bf16.msra.mxu0 %v920_v4  ;;  %891 = vmatpush3.bf16.msra.mxu1 %v920_v4 }
  0x17   : > { %877 = vmatmul.mubr.msk.bf16.vlgmr.msra.gmra.mrb[0].mxu0 %vm446_vm0, %v922_v6  ;;  %881 = vmatmul.mubr.msk.bf16.vlgmr.msra.gmra.mrb[0].mxu1 %vm446_vm0, %v924_v7  ;;  %v546_v61 = vld [vmem:[%s1026_s11] sm:$0x1] }
  0x18   : > { %v562_v0 = vld [vmem:[%s1032_s14] sm:$0x1] }
  0xea   : > { %v878_v10 = vpop.f32.mrb[0].mxu0  ;;  %v882_v11 = vpop.f32.mrb[0].mxu1 }
  0xeb   : > { %v493_v12 = vpop.f32.mrb[1].mxu0  ;;  %v518_v13 = vadd.f32 %v882_v11, %v820_v9  ;;  %v509_v14 = vpop.f32.mrb[1].mxu1  ;;  %v502_v19 = vadd.f32 %v878_v10, %v820_v9 }
  0xec   : > { %v494_v15 = vadd.f32 %v820_v9, %v493_v12  ;;  %v879_v16 = vpop.f32.mrb[2].mxu0  ;;  %v510_v17 = vadd.f32 %v820_v9, %v509_v14  ;;  %v883_v18 = vpop.f32.mrb[2].mxu1 }
  0xed   : > { %v505_v20 = vadd.f32 %v879_v16, %v820_v9  ;;  %v496_v21 = vpop.f32.mrb[3].mxu0  ;;  %v521_v22 = vadd.f32 %v883_v18, %v820_v9  ;;  %v512_v23 = vpop.f32.mrb[3].mxu1  ;;  %v565_v33 = vmul.f32 %v502_v19, %v502_v19  ;;  %v569_v45 = vmul.f32 %v518_v13, %v518_v13 }
  0xee   : > { %v497_v24 = vadd.f32 %v820_v9, %v496_v21  ;;  %v513_v25 = vadd.f32 %v820_v9, %v512_v23  ;;  %v563_v26 = vmul.f32 %v494_v15, %v494_v15  ;;  %v567_v39 = vmul.f32 %v510_v17, %v510_v17 }
  0xef   : > { %v845_v27 = vpack.c.bf16 %v505_v20, %v502_v19  ;;  %v855_v28 = vpack.c.bf16 %v521_v22, %v518_v13  ;;  %v566_v36 = vmul.f32 %v505_v20, %v505_v20  ;;  %v570_v48 = vmul.f32 %v521_v22, %v521_v22 }
  0xf0   : > { %v840_v29 = vpack.c.bf16 %v497_v24, %v494_v15  ;;  %v547_v30 = vadd.f32 %v497_v24, %v494_v15  ;;  %v564_v31 = vmul.f32 %v497_v24, %v497_v24  ;;  %v850_v32 = vpack.c.bf16 %v513_v25, %v510_v17 }
  0xf1   : > { %857 = vst [vmem:[%s357_s23 + $0x8] sm:$0xff] %v845_v27   ;;  %859 = vst [vmem:[%s357_s23 + $0x18] sm:$0xff] %v855_v28   ;;  %v568_v44 = vmul.f32 %v513_v25, %v513_v25 }
  0xf2   : > { %841 = vst [vmem:[%s357_s23] sm:$0xff] %v840_v29   ;;  %v548_v34 = vadd.f32 %v547_v30, %v502_v19  ;;  %v571_v35 = vadd.f32 %v564_v31, %v563_v26  ;;  %858 = vst [vmem:[%s357_s23 + $0x10] sm:$0xff] %v850_v32  }
  0xf4   : > { %v572_v37 = vadd.f32 %v571_v35, %v565_v33  ;;  %v549_v38 = vadd.f32 %v548_v34, %v505_v20 }
  0xf6   : > { %v550_v40 = vadd.f32 %v549_v38, %v510_v17  ;;  %v573_v41 = vadd.f32 %v572_v37, %v566_v36 }
  0xf8   : > { %v574_v42 = vadd.f32 %v573_v41, %v567_v39  ;;  %v551_v43 = vadd.f32 %v550_v40, %v513_v25 }
  0xfa   : > { %v552_v46 = vadd.f32 %v551_v43, %v518_v13  ;;  %v575_v47 = vadd.f32 %v574_v42, %v568_v44 }
  0xfc   : > { %v553_v49 = vadd.f32 %v552_v46, %v521_v22  ;;  %v576_v50 = vadd.f32 %v575_v47, %v569_v45 }
  0xfe   : > { %v554_v51 = vrot.slane %v553_v49, 4  ;;  %v577_v52 = vadd.f32 %v576_v50, %v570_v48 }
 0x100   : > { %v555_v53 = vadd.f32 %v554_v51, %v553_v49  ;;  %v578_v54 = vrot.slane %v577_v52, 4 }
 0x102   : > { %v556_v55 = vrot.slane %v555_v53, 2  ;;  %v579_v56 = vadd.f32 %v578_v54, %v577_v52 }
 0x104   : > { %v557_v57 = vadd.f32 %v556_v55, %v555_v53  ;;  %v580_v58 = vrot.slane %v579_v56, 2 }
 0x106   : > { %v558_v59 = vrot.slane %v557_v57, 1  ;;  %v581_v60 = vadd.f32 %v580_v58, %v579_v56 }
 0x108   : > { %v559_v62 = vadd.f32 %v558_v59, %v557_v57  ;;  %v582_v63 = vrot.slane %v581_v60, 1 }
 0x10a   : > { %v560_v1 = vadd.f32 %v559_v62, %v546_v61  ;;  %v583_v2 = vadd.f32 %v582_v63, %v581_v60 }
 0x10c   : > { %561 = vst [vmem:[%s1026_s11] sm:$0x1] %v560_v1  ;;  %v584_v3 = vadd.f32 %v583_v2, %v562_v0 }
 0x10e   : > { %585 = vst [vmem:[%s1032_s14] sm:$0x1] %v584_v3 }
 0x10f PF: > { %s16_s20 = sadd.s32 1, %s947_s20   ;;  %s1063_s18 = smov %s943_s19 }
 0x110   : > { %p13_p5 = scmp.ge.s32.totalorder %s16_s20, 4   ;;  %s1064_s19 = smov %s1066_s21 }
 0x112   :  { %15 = sbr.rel (!%p13_p5) target bundleno = 2 (0x2), region = 96 }

</bundles_post_ra>
